<compile_context>
chip_gen: v7x
topology: tpu7x:2x2x1
jax: 0.10.0
libtpu: 0.0.40
codegen_flags: <defaults>
</compile_context>

<pallas_src>
import math

import jax
import jax.numpy as jnp
from jax.experimental import pallas as pl
from jax.experimental.pallas import tpu as pltpu

_TARGET_TILE_BYTES = 2 * 1024 * 1024  # ~2 MiB of in+out per grid step.


def _cls_concat_flat_kernel(w_ref, emb_ref, out_ref):
    """Flattened layout: out[:, 0:D] = cls, out[:, D:(S+1)*D] = emb.

    All slice offsets/sizes are multiples of 128 (caller guarantees
    D % 128 == 0), so every store is lane/sublane aligned and unmasked.
    """
    bb = out_ref.shape[0]
    d = w_ref.shape[-1]
    s_d = emb_ref.shape[1]
    out_ref[:, pl.ds(0, d)] = jnp.broadcast_to(
        w_ref[...].astype(out_ref.dtype), (bb, d))
    out_ref[:, pl.ds(d, s_d)] = emb_ref[...].astype(out_ref.dtype)


def _cls_concat_3d_kernel(w_ref, emb_ref, out_ref):
    """Fallback (D % 128 != 0): concat along the sequence axis in 3-D layout."""
    bb, s, d = emb_ref.shape
    out_ref[:, pl.ds(0, 1), :] = jnp.broadcast_to(
        w_ref[...].astype(out_ref.dtype), (bb, 1, d))
    out_ref[:, pl.ds(1, s), :] = emb_ref[...].astype(out_ref.dtype)


def _choose_batch_block(b: int, s: int, d: int,
                        in_itemsize: int, out_itemsize: int) -> int:
    """Batch rows per grid step: ~2 MiB tiles, >= ~4 grid steps when B allows."""
    per_row = s * d * in_itemsize + (s + 1) * d * out_itemsize
    bb = max(1, _TARGET_TILE_BYTES // max(per_row, 1))
    if b >= 4:
        # Keep at least ~4 grid steps (>= 2 per TensorCore on dual-TC chips)
        # so megacore sharding and DMA/store overlap stay effective.
        bb = min(bb, pl.cdiv(b, 4))
    return int(min(bb, b))


def transtab_cls_token(weight, embedding, attention_mask=None):
    """Pallas equivalent of TransTabCLSToken.forward.

    Args:
      weight: [D] learnable CLS token.
      embedding: [B, S, D].
      attention_mask: optional [B, S].

    Returns:
      dict with 'embedding' [B, S+1, D] and 'attention_mask' [B, S+1] (or None).
    """
    b, s, d = embedding.shape
    # torch.cat type-promotes; do the same (no silent downcast of the param).
    out_dtype = jnp.result_type(weight.dtype, embedding.dtype)
    in_itemsize = jnp.dtype(embedding.dtype).itemsize
    out_itemsize = jnp.dtype(out_dtype).itemsize

    bb = _choose_batch_block(b, s, d, in_itemsize, out_itemsize)
    grid = (pl.cdiv(b, bb),)  # ragged last block handled by Pallas.
    cparams = pltpu.CompilerParams(dimension_semantics=("parallel",))

    if d % 128 == 0:
        # Lane-aligned fast path on the flattened layout.
        n_in = s * d
        n_out = (s + 1) * d
        w2 = weight.reshape(1, d)
        emb_flat = embedding.reshape(b, n_in)
        out_flat = pl.pallas_call(
            _cls_concat_flat_kernel,
            out_shape=jax.ShapeDtypeStruct((b, n_out), out_dtype),
            grid=grid,
            in_specs=[
                pl.BlockSpec((1, d), lambda i: (0, 0)),
                pl.BlockSpec((bb, n_in), lambda i: (i, 0)),
            ],
            out_specs=pl.BlockSpec((bb, n_out), lambda i: (i, 0)),
            compiler_params=cparams,
        )(w2, emb_flat)
        out_emb = out_flat.reshape(b, s + 1, d)
    else:
        # Fallback 3-D layout for D not divisible by 128.
        w3 = weight.reshape(1, 1, d)
        out_emb = pl.pallas_call(
            _cls_concat_3d_kernel,
            out_shape=jax.ShapeDtypeStruct((b, s + 1, d), out_dtype),
            grid=grid,
            in_specs=[
                pl.BlockSpec((1, 1, d), lambda i: (0, 0, 0)),
                pl.BlockSpec((bb, s, d), lambda i: (i, 0, 0)),
            ],
            out_specs=pl.BlockSpec((bb, s + 1, d), lambda i: (i, 0, 0)),
            compiler_params=cparams,
        )(w3, embedding)

    out_mask = None
    if attention_mask is not None:
        # Tiny (B x (S+1)) concat: plain XLA instead of a lane-dim-1 kernel
        # output layout.
        out_mask = jnp.concatenate(
            [jnp.ones((b, 1), dtype=attention_mask.dtype), attention_mask],
            axis=1)

    return {"embedding": out_emb, "attention_mask": out_mask}


def _reference(weight, embedding, attention_mask):
    """Plain-JAX mirror of the PyTorch forward."""
    b, s, d = embedding.shape
    out_dtype = jnp.result_type(weight.dtype, embedding.dtype)
    cls = jnp.broadcast_to(weight.reshape(1, 1, d), (b, 1, d)).astype(out_dtype)
    ref_emb = jnp.concatenate([cls, embedding.astype(out_dtype)], axis=1)
    ref_mask = None
    if attention_mask is not None:
        ref_mask = jnp.concatenate(
            [jnp.ones((b, 1), dtype=attention_mask.dtype), attention_mask],
            axis=1)
    return ref_emb, ref_mask


if __name__ == "__main__":
    key = jax.random.PRNGKey(0)
    k_w, k_emb, k_mask = jax.random.split(key, 3)

    # Case 1: D a multiple of 128 -> flattened lane-aligned fast path.
    B, S, D = 2, 8, 128
    bound = 1.0 / math.sqrt(D)
    weight = jax.random.uniform(
        k_w, (D,), dtype=jnp.float32, minval=-bound, maxval=bound)
    embedding = jax.random.normal(k_emb, (B, S, D), dtype=jnp.float32)
    attention_mask = (
        jax.random.uniform(k_mask, (B, S)) > 0.3).astype(jnp.float32)

    out = transtab_cls_token(weight, embedding, attention_mask)
    out_emb = jax.block_until_ready(out["embedding"])
    out_mask = jax.block_until_ready(out["attention_mask"])
    ref_emb, ref_mask = _reference(weight, embedding, attention_mask)
    assert out_emb.shape == (B, S + 1, D)
    assert out_mask.shape == (B, S + 1)
    assert jnp.allclose(out_emb, ref_emb)
    assert jnp.allclose(out_mask, ref_mask)

    # Case 2: D not a multiple of 128 (hidden=32) -> 3-D fallback; no mask.
    B2, S2, D2 = 3, 8, 32
    bound2 = 1.0 / math.sqrt(D2)
    w_b = jax.random.uniform(
        k_w, (D2,), dtype=jnp.float32, minval=-bound2, maxval=bound2)
    emb_b = jax.random.normal(k_emb, (B2, S2, D2), dtype=jnp.float32)
    out2 = transtab_cls_token(w_b, emb_b, None)
    ref2, _ = _reference(w_b, emb_b, None)
    assert jnp.allclose(jax.block_until_ready(out2["embedding"]), ref2)
    assert out2["attention_mask"] is None

    # Case 3: mixed dtypes (f32 param, bf16 embedding) -> promoted like torch.cat.
    emb_bf16 = embedding.astype(jnp.bfloat16)
    out3 = transtab_cls_token(weight, emb_bf16, attention_mask)
    ref3, _ = _reference(weight, emb_bf16, attention_mask)
    out3_emb = jax.block_until_ready(out3["embedding"])
    assert out3_emb.dtype == jnp.float32
    assert jnp.allclose(out3_emb, ref3)

    print("KERNEL_OK")
</pallas_src>

<mosaic_0001>
module attributes {stable_mosaic.version = 11 : i64} {
  func.func @_cls_concat_flat_kernel(%arg0: i32, %arg1: memref<1x128xf32, #tpu.memory_space<vmem>>, %arg2: memref<2x1024xf32, #tpu.memory_space<vmem>>, %arg3: memref<2x1152xf32, #tpu.memory_space<vmem>>) attributes {dimension_semantics = [#tpu.dimension_semantics<parallel>], iteration_bounds = array<i64: 1>, scalar_prefetch = 0 : i64, scratch_operands = 0 : i64, tpu.core_type = #tpu.core_type<tc>, window_params = [{pipeline_mode = #tpu.pipeline_mode<synchronous>, transform_indices = @transform_0, window_bounds = array<i64: 1, 128>}, {transform_indices = @transform_1, window_bounds = array<i64: 2, 1024>}, {transform_indices = @transform_2, window_bounds = array<i64: 2, 1152>}]} {
    %c0 = arith.constant 0 : index
    %c0_0 = arith.constant 0 : index
    %0 = vector.load %arg1[%c0, %c0_0] : memref<1x128xf32, #tpu.memory_space<vmem>>, vector<1x128xf32>
    %1 = vector.shape_cast %0 : vector<1x128xf32> to vector<1x128xf32>
    %2 = vector.broadcast %1 : vector<1x128xf32> to vector<2x128xf32>
    %c0_1 = arith.constant 0 : index
    %c0_2 = arith.constant 0 : index
    %3 = vector.load %arg3[%c0_1, %c0_2] : memref<2x1152xf32, #tpu.memory_space<vmem>>, vector<2x128xf32>
    tpu.vector_store %arg3[%c0_1, %c0_2], %2 {strides = array<i32>} : memref<2x1152xf32, #tpu.memory_space<vmem>>, vector<2x128xf32>,
    %c0_3 = arith.constant 0 : index
    %c0_4 = arith.constant 0 : index
    %4 = vector.load %arg2[%c0_3, %c0_4] : memref<2x1024xf32, #tpu.memory_space<vmem>>, vector<2x1024xf32>
    %c0_5 = arith.constant 0 : index
    %c128 = arith.constant 128 : index
    %5 = vector.load %arg3[%c0_5, %c128] : memref<2x1152xf32, #tpu.memory_space<vmem>>, vector<2x1024xf32>
    tpu.vector_store %arg3[%c0_5, %c128], %4 {strides = array<i32>} : memref<2x1152xf32, #tpu.memory_space<vmem>>, vector<2x1024xf32>,
    return
  }
  func.func @transform_0(%arg0: i32) -> (i32, i32) {
    %c0_i32 = arith.constant 0 : i32
    %c0_i32_0 = arith.constant 0 : i32
    %c0_i32_1 = arith.constant 0 : i32
    return %c0_i32, %c0_i32_0 : i32, i32
  }
  func.func @transform_1(%arg0: i32) -> (i32, i32) {
    %c0_i32 = arith.constant 0 : i32
    %c0_i32_0 = arith.constant 0 : i32
    return %arg0, %c0_i32 : i32, i32
  }
  func.func @transform_2(%arg0: i32) -> (i32, i32) {
    %c0_i32 = arith.constant 0 : i32
    %c0_i32_0 = arith.constant 0 : i32
    return %arg0, %c0_i32 : i32, i32
  }
}

</mosaic_0001>

<bundles_post_ra>
// kernel: tpu_custom_call.1
= control target key start
LH: loop header
LB: loop body
LE: loop exit
PB: predicated region body
PF: predicated region fallthrough
CT: control target
= control target key end

     0   :  { %7 = vsyncpa [#allocation3], 0  ;;  %s194_s0 = inlined_call_operand.hbm [shape: f32[1,128], index: 0, kind: input, shape index: {}]   ;;  %s195_s1 = inlined_call_operand.hbm [shape: f32[2,1024], index: 1, kind: input, shape index: {}]   ;;  %s196_s2 = inlined_call_operand.hbm [shape: f32[2,1152], index: 2, kind: output, shape index: {}]  }
   0x1   :  { %8 = vsyncpa [#allocation6], 0 }
   0x2   :  { %9 = vsyncpa [#allocation4], 0  ;;  %s140_s9 = smov [#allocation2]   ;;  %s141_s11 = smov [#allocation5]  }
   0x3   :  { %s16_s10 = sshll.u32 %s140_s9, 4  ;;  %s26_s12 = sshll.u32 %s141_s11, 4  ;;  %s17_s10 = int_to_ptr.vmem [resolvable:$true] %s16_s10  ;;  %s27_s12 = int_to_ptr.vmem [resolvable:$true] %s26_s12 }
   0x4   :  { %s68_s15 = scalar_lea.hbm %s194_s0, 16 }
   0x5   :  { %p69_p0 = scmp.ne.s32.totalorder %s194_s0, %s68_s15  ;;  %p72_p1 = scmp.lt.u32.totalorder %s68_s15, %s194_s0 }
   0x7   :  { %p74_p2 = pnand %p72_p1, %p69_p0 }
   0x9   :  { %77 = shalt.err (!%p74_p2)
}
   0xa   :  { %s78_s20 = scalar_lea.vmem %s17_s10, 16  ;;  %s82_s21 = scalar_lea.vmem %s17_s10, 32 }
   0xb   :  { %p79_p3 = scmp.ne.s32.totalorder %s17_s10, %s78_s20  ;;  %p83_p4 = scmp.lt.s32.totalorder %s17_s10, %s17_s10 }
   0xc   :  { %p84_p5 = scmp.lt.s32.totalorder %s82_s21, %s78_s20 }
   0xe   :  { %p85_p6 = por %p84_p5, %p83_p4 }
  0x10   :  { %p86_p7 = pnand %p85_p6, %p79_p3 }
  0x12   :  { %89 = shalt.err (!%p86_p7)
}
  0x13   :  { %19 = dma.hbm_to_vmem [thread:$0]  %s194_s0, 16, %s17_s10, [#allocation3]  }
  0x14   :  { %s90_s26 = scalar_lea.hbm %s195_s1, 256 }
  0x15   :  { %p91_p8 = scmp.ne.s32.totalorder %s195_s1, %s90_s26  ;;  %p94_p9 = scmp.lt.u32.totalorder %s90_s26, %s195_s1 }
  0x17   :  { %p96_p10 = pnand %p94_p9, %p91_p8 }
  0x19   :  { %99 = shalt.err (!%p96_p10)
}
  0x1a   :  { %s100_s3 = scalar_lea.vmem %s27_s12, 256  ;;  %p105_p12 = scmp.lt.s32.totalorder %s27_s12, %s27_s12 }
  0x1b   :  { %p101_p11 = scmp.ne.s32.totalorder %s27_s12, %s100_s3  ;;  %p106_p13 = scmp.lt.s32.totalorder %s100_s3, %s100_s3 }
  0x1d   :  { %p107_p0 = por %p106_p13, %p105_p12 }
  0x1f   :  { %p108_p1 = pnand %p107_p0, %p101_p11 }
  0x21   :  { %111 = shalt.err (!%p108_p1)
}
  0x22   :  { %29 = dma.hbm_to_vmem [thread:$0]  %s195_s1, 256, %s27_s12, [#allocation6]  }
  0x23   :  { %134 = dma.done.wait [#allocation3], 16  }
  0x24   :  { %135 = vsyncadd [#allocation3], 4294967280 }
  0x25   :  { %136 = dma.done.wait [#allocation6], 256  }
  0x26   :  { %137 = vsyncadd [#allocation6], 4294967040  ;;  %s142_s5 = smov [#allocation7]   ;;  %v64_v0 = vld [vmem:[#allocation2] ss:$0 sm:$0xff]  ;;  %v44_v1 = vld [vmem:[#allocation5] sm:$0xff] }
  0x27   :  { %s54_s6 = sshll.u32 %s142_s5, 4  ;;  %v45_v2 = vld [vmem:[#allocation5 + $0x8] sm:$0xff]  ;;  %43 = vst [vmem:[#allocation7] sm:$0x3] %v64_v0  ;;  %46 = vst [vmem:[#allocation7 + $0x2] sm:$0xff] %v44_v1  ;;  %s55_s6 = int_to_ptr.vmem [resolvable:$true] %s54_s6 }
  0x28   :  { %47 = vst [vmem:[#allocation7 + $0xa] sm:$0xff] %v45_v2  ;;  %s112_s7 = scalar_lea.vmem %s55_s6, 288  ;;  %p117_p3 = scmp.lt.s32.totalorder %s55_s6, %s55_s6 }
  0x29   :  { %p113_p2 = scmp.ne.s32.totalorder %s55_s6, %s112_s7  ;;  %p118_p4 = scmp.lt.s32.totalorder %s112_s7, %s112_s7 }
  0x2b   :  { %p119_p5 = por %p118_p4, %p117_p3 }
  0x2d   :  { %p120_p6 = pnand %p119_p5, %p113_p2 }
  0x2f   :  { %123 = shalt.err (!%p120_p6)
}
  0x30   :  { %s124_s9 = scalar_lea.hbm %s196_s2, 288 }
  0x31   :  { %p125_p7 = scmp.ne.s32.totalorder %s196_s2, %s124_s9  ;;  %p128_p8 = scmp.lt.u32.totalorder %s124_s9, %s196_s2 }
  0x33   :  { %p130_p9 = pnand %p128_p8, %p125_p7 }
  0x35   :  { %133 = shalt.err (!%p130_p9)
}
  0x36   :  { %57 = dma.vmem_to_hbm [thread:$0]  %s55_s6, 288, %s196_s2, [#allocation4]  }
  0x37   :  { %138 = dma.done.wait [#allocation4], 288  }
  0x38   :  { %139 = vsyncadd [#allocation4], 4294967008 }
  0x39   :  { %61 = vsyncpa [#allocation3], 1 }
  0x3a   :  { %62 = vsyncpa [#allocation6], 1 }
  0x3b   :  { %63 = vsyncpa [#allocation4], 1 }

</bundles_post_ra>
